<compile_context>
chip_gen: v7x
topology: tpu7x:2x2x1
jax: 0.10.0
libtpu: 0.0.40
codegen_flags: <defaults>
</compile_context>

<pallas_src>
import math

import jax
import jax.numpy as jnp
from jax import lax
from jax.experimental import pallas as pl
from jax.experimental.pallas import tpu as pltpu

# ---- ModelArgs (small, self-consistent) ----
B = 2                      # batch (== reasoner_max_batch_size)
L = 8                      # sequence length of this forward call
D = 64                     # reasoner_hidden_dim
H = 4                      # reasoner_num_heads
KVH = 2                    # reasoner_num_kv_heads  (GQA, n_rep = 2)
HD = 16                    # reasoner_head_dim
NREP = H // KVH
MAXPOS = 16                # reasoner_max_position_embeddings
START_POS = 4              # static start_pos for this call (cache prefix attended)
KL = START_POS + L         # attended key/value length after the cache update
ROPE_THETA = 10000.0

QD = H * HD                # 64
KVD = KVH * HD             # 32
HALF = QD + 2 * KVD        # 128   [q | k | v]
PROJ = 2 * HALF            # 256   [q | k | v | q_rot | k_rot | 0]
NEG = -1e30


# ---------------- the fused Pallas kernel ----------------
def reasoner_attention_kernel(x_ref, w_ref, wo_ref, cs_ref, repl_ref, blk_ref,
                              ck_in_ref, cv_in_ref,
                              out_ref, ck_out_ref, cv_out_ref):
    T = B * L

    # ---- fused QKV(+rot) projection: one (T,64)x(64,256) bf16 MXU pass ----
    x2 = x_ref[...].reshape(T, D).astype(jnp.bfloat16)
    proj = jnp.dot(x2, w_ref[...], preferred_element_type=jnp.float32)      # (T, 256) f32

    # RoPE folded into the weight: qkv = proj[:, :128]*cos + proj[:, 128:]*sin
    # (the v columns have cos = 1 and sin = 0, so v passes through untouched).
    rot = proj * cs_ref[...]
    qkv = rot[:, :HALF] + rot[:, HALF:]                                     # (T, 128) f32

    q = qkv[:, :QD]                           # 1/sqrt(HD) already folded into wq
    k3 = qkv[:, QD:QD + KVD].reshape(B, L, KVD)
    v3 = qkv[:, QD + KVD:HALF].reshape(B, L, KVD)

    # ---- KV cache update, assembled in registers (no store->load round trip) ----
    keys_full = jnp.concatenate(
        [ck_in_ref[:, :START_POS, :], k3, ck_in_ref[:, KL:, :]], axis=1)    # (B, MAXPOS, KVD)
    vals_full = jnp.concatenate(
        [cv_in_ref[:, :START_POS, :], v3, cv_in_ref[:, KL:, :]], axis=1)
    ck_out_ref[...] = keys_full               # aliased with the input cache buffer
    cv_out_ref[...] = vals_full

    # ---- GQA repeat_kv via a constant 0/1 matmul, then per-batch block-diagonal
    #      K / V operands so attention is two batched (batch = B) einsums ----
    repl = repl_ref[...]                                                    # (KVD, QD) bf16
    blk_f32 = blk_ref[...]                                                  # (64, 64) block(16) selector
    keys_rep = jnp.dot(keys_full.reshape(B * MAXPOS, KVD).astype(jnp.bfloat16),
                       repl, preferred_element_type=jnp.float32
                       ).reshape(B, MAXPOS, QD)
    vals_rep = jnp.dot(vals_full.reshape(B * MAXPOS, KVD).astype(jnp.bfloat16),
                       repl, preferred_element_type=jnp.float32
                       ).reshape(B, MAXPOS, QD)
    # kbig[b, (h,m), (h',d)] = keys[b, m, kv(h')*HD + d] * (h == h')   (same for vbig)
    kbig = (jnp.concatenate([keys_rep] * H, axis=1) * blk_f32[None]).astype(jnp.bfloat16)
    vbig = (jnp.concatenate([vals_rep] * H, axis=1) * blk_f32[None]).astype(jnp.bfloat16)

    # ---- scores: (B, L, QD) x (B, H*MAXPOS, QD) -> (B, L, H*MAXPOS) ----
    q3 = q.reshape(B, L, QD).astype(jnp.bfloat16)
    scores = jnp.einsum('bld,bmd->blm', q3, kbig,
                        preferred_element_type=jnp.float32)                 # cols = (head, key_pos)

    # causal + cache-tail mask, built in-kernel (also masks the padded MAXPOS tail)
    li = lax.broadcasted_iota(jnp.int32, (L, MAXPOS), 0)
    mi = lax.broadcasted_iota(jnp.int32, (L, MAXPOS), 1)
    mask1 = jnp.where(mi <= li + START_POS, 0.0, NEG)                       # (L, MAXPOS) f32
    mask = jnp.concatenate([mask1] * H, axis=-1)                            # (L, H*MAXPOS)
    scores = scores + mask[None]

    # ---- per-head softmax over each 16-wide block (all f32) ----
    mrow = jnp.max(scores, axis=-1, keepdims=True)    # common per-row shift: block-invariant
    e = jnp.exp(scores - mrow)
    e2 = e.reshape(T, H * MAXPOS)
    blk_bf = blk_f32.astype(jnp.bfloat16)
    denom = jnp.dot(e2.astype(jnp.bfloat16), blk_bf,
                    preferred_element_type=jnp.float32)    # block sums, broadcast within block
    p3 = (e2 * pl.reciprocal(denom, approx=True)
          ).reshape(B, L, H * MAXPOS).astype(jnp.bfloat16)

    # ---- weighted values: lands directly in (B, L, H*HD) head-major layout ----
    attn = jnp.einsum('blm,bmd->bld', p3, vbig, preferred_element_type=jnp.float32)

    # ---- output projection ----
    out = jnp.dot(attn.reshape(T, QD).astype(jnp.bfloat16), wo_ref[...],
                  preferred_element_type=jnp.float32)
    out_ref[...] = out.astype(out_ref.dtype)              # (B*L, D)


# ---------------- pallas_call wrapper ----------------
def _vmem():
    return pl.BlockSpec(memory_space=pltpu.MemorySpace.VMEM)


@jax.jit
def reasoner_attention(x, w_fused, wo, cs, repl, blk, cache_k, cache_v):
    out, new_k, new_v = pl.pallas_call(
        reasoner_attention_kernel,
        out_shape=(
            jax.ShapeDtypeStruct((B * L, D), jnp.float32),
            jax.ShapeDtypeStruct((B, MAXPOS, KVD), jnp.float32),
            jax.ShapeDtypeStruct((B, MAXPOS, KVD), jnp.float32),
        ),
        in_specs=[_vmem()] * 8,
        out_specs=(_vmem(), _vmem(), _vmem()),
        # KV caches are read-modify-write: alias them so the runtime reuses the
        # buffers instead of materializing fresh HBM outputs each call.
        input_output_aliases={6: 1, 7: 2},
    )(x, w_fused, wo, cs, repl, blk, cache_k, cache_v)
    return out.reshape(B, L, D), new_k, new_v


# ---------------- host-side constants (weights fold / freqs_cis equivalents) ----------------
def rot_matrix(n):
    # R with (t @ R)[2j] = -t[2j+1] and (t @ R)[2j+1] = t[2j]  (interleaved RoPE pair swap)
    r = jnp.arange(n)[:, None]
    c = jnp.arange(n)[None, :]
    plus = ((r % 2 == 0) & (c == r + 1)).astype(jnp.float32)
    minus = ((r % 2 == 1) & (c == r - 1)).astype(jnp.float32)
    return plus - minus


def fuse_weights(wq, wk, wv):
    scale = 1.0 / math.sqrt(HD)              # fold score scale into wq (exact: 2^-2)
    cos_half = jnp.concatenate([wq * scale, wk, wv], axis=1)
    sin_half = jnp.concatenate([(wq @ rot_matrix(QD)) * scale, wk @ rot_matrix(KVD),
                                jnp.zeros((D, KVD), jnp.float32)], axis=1)
    return jnp.concatenate([cos_half, sin_half], axis=1).astype(jnp.bfloat16)   # (D, 256)


def rope_tables():
    inv_freq = 1.0 / (ROPE_THETA ** (jnp.arange(0, HD, 2, dtype=jnp.float32) / HD))
    pos = jnp.arange(START_POS, START_POS + L, dtype=jnp.float32)
    ang = pos[:, None] * inv_freq[None, :]                  # (L, HD//2)
    cos, sin = jnp.cos(ang), jnp.sin(ang)
    cosf = jnp.repeat(cos, 2, axis=-1)                      # (L, HD), duplicated per pair
    sinf = jnp.repeat(sin, 2, axis=-1)
    ones_v = jnp.ones((L, KVD), jnp.float32)
    zeros_v = jnp.zeros((L, KVD), jnp.float32)
    cos_half = jnp.concatenate([jnp.tile(cosf, (1, H)), jnp.tile(cosf, (1, KVH)), ones_v], axis=-1)
    sin_half = jnp.concatenate([jnp.tile(sinf, (1, H)), jnp.tile(sinf, (1, KVH)), zeros_v], axis=-1)
    cs = jnp.tile(jnp.concatenate([cos_half, sin_half], axis=-1), (B, 1))       # (B*L, 256)
    return cos, sin, cs


def build_repl():
    # (KVD, QD) 0/1 selector: column (h, d) picks kv-head h // NREP, dim d  (GQA repeat_kv)
    i = jnp.arange(KVD)[:, None]
    j = jnp.arange(QD)[None, :]
    sel = ((i // HD) == ((j // HD) // NREP)) & ((i % HD) == (j % HD))
    return jnp.where(sel, 1.0, 0.0).astype(jnp.bfloat16)


def build_blk():
    # (H*MAXPOS, QD) block(16)-diagonal selector: row head-block == col head-block
    r = jnp.arange(H * MAXPOS)[:, None] // MAXPOS
    c = jnp.arange(QD)[None, :] // HD
    return (r == c).astype(jnp.float32)


# ---------------- pure-JAX reference (mirrors the PyTorch forward) ----------------
def causal_mask_ref():
    row = jnp.arange(L)[:, None]
    col = jnp.arange(KL)[None, :]
    return jnp.where(col <= row + START_POS, 0.0, NEG).astype(jnp.float32)


def reference(x, wq, wk, wv, wo, cos, sin, mask, cache_k, cache_v):
    q = (x @ wq).reshape(B, L, H, HD)
    k = (x @ wk).reshape(B, L, KVH, HD)
    v = (x @ wv).reshape(B, L, KVH, HD)

    def rope(t):
        tr, ti = t[..., 0::2], t[..., 1::2]
        c = cos[None, :, None, :]
        s = sin[None, :, None, :]
        return jnp.stack([tr * c - ti * s, tr * s + ti * c], axis=-1).reshape(t.shape)

    q, k = rope(q), rope(k)
    ck = cache_k.reshape(B, MAXPOS, KVH, HD).at[:, START_POS:KL].set(k)
    cv = cache_v.reshape(B, MAXPOS, KVH, HD).at[:, START_POS:KL].set(v)
    keys = jnp.repeat(ck[:, :KL], NREP, axis=2)             # repeat_kv
    vals = jnp.repeat(cv[:, :KL], NREP, axis=2)
    qT = q.transpose(0, 2, 1, 3)
    kT = keys.transpose(0, 2, 1, 3)
    vT = vals.transpose(0, 2, 1, 3)
    scores = qT @ kT.transpose(0, 1, 3, 2) / math.sqrt(HD) + mask[None, None]
    p = jax.nn.softmax(scores, axis=-1)
    out = (p @ vT).transpose(0, 2, 1, 3).reshape(B, L, H * HD) @ wo
    return out, ck.reshape(B, MAXPOS, KVD), cv.reshape(B, MAXPOS, KVD)


if __name__ == "__main__":
    key = jax.random.PRNGKey(0)
    kx, kq, kk, kv, ko = jax.random.split(key, 5)
    x = jax.random.normal(kx, (B, L, D), jnp.float32)
    wq = 0.05 * jax.random.normal(kq, (D, QD), jnp.float32)
    wk = 0.05 * jax.random.normal(kk, (D, KVD), jnp.float32)
    wv = 0.05 * jax.random.normal(kv, (D, KVD), jnp.float32)
    wo = 0.05 * jax.random.normal(ko, (QD, D), jnp.float32)

    cache_k = jnp.zeros((B, MAXPOS, KVD), jnp.float32)      # torch.zeros KV caches
    cache_v = jnp.zeros((B, MAXPOS, KVD), jnp.float32)

    w_fused = fuse_weights(wq, wk, wv)                      # (D, 256) bf16, RoPE + scale folded
    cos, sin, cs = rope_tables()                            # cs: (B*L, 256) [cos | sin] table
    repl = build_repl()
    blk = build_blk()

    out, new_ck, new_cv = reasoner_attention(
        x, w_fused, wo.astype(jnp.bfloat16), cs, repl, blk, cache_k, cache_v)
    jax.block_until_ready((out, new_ck, new_cv))

    ref_out, ref_ck, ref_cv = reference(
        x, wq, wk, wv, wo, cos, sin, causal_mask_ref(), cache_k, cache_v)

    assert out.shape == (B, L, D) and out.dtype == jnp.float32
    assert bool(jnp.allclose(out, ref_out, rtol=5e-2, atol=2e-2))
    assert bool(jnp.allclose(new_ck, ref_ck, rtol=5e-2, atol=2e-2))
    assert bool(jnp.allclose(new_cv, ref_cv, rtol=5e-2, atol=2e-2))
    print("KERNEL_OK")
</pallas_src>

<mosaic_0001>
module attributes {stable_mosaic.version = 11 : i64} {
  func.func @reasoner_attention_kernel(%arg0: memref<2x8x64xf32, #tpu.memory_space<vmem>>, %arg1: memref<64x256xbf16, #tpu.memory_space<vmem>>, %arg2: memref<64x64xbf16, #tpu.memory_space<vmem>>, %arg3: memref<16x256xf32, #tpu.memory_space<vmem>>, %arg4: memref<32x64xbf16, #tpu.memory_space<vmem>>, %arg5: memref<64x64xf32, #tpu.memory_space<vmem>>, %arg6: memref<2x16x32xf32, #tpu.memory_space<vmem>>, %arg7: memref<2x16x32xf32, #tpu.memory_space<vmem>>, %arg8: memref<16x64xf32, #tpu.memory_space<vmem>>, %arg9: memref<2x16x32xf32, #tpu.memory_space<vmem>>, %arg10: memref<2x16x32xf32, #tpu.memory_space<vmem>>) attributes {dimension_semantics = [], scalar_prefetch = 0 : i64, scratch_operands = 0 : i64, tpu.core_type = #tpu.core_type<tc>} {
    %c0 = arith.constant 0 : index
    %c0_0 = arith.constant 0 : index
    %c0_1 = arith.constant 0 : index
    %0 = vector.load %arg0[%c0, %c0_0, %c0_1] : memref<2x8x64xf32, #tpu.memory_space<vmem>>, vector<2x8x64xf32>
    %1 = vector.shape_cast %0 : vector<2x8x64xf32> to vector<16x64xf32>
    %2 = arith.truncf %1 : vector<16x64xf32> to vector<16x64xbf16>
    %c0_2 = arith.constant 0 : index
    %c0_3 = arith.constant 0 : index
    %3 = vector.load %arg1[%c0_2, %c0_3] : memref<64x256xbf16, #tpu.memory_space<vmem>>, vector<64x256xbf16>
    %cst = arith.constant dense<0.000000e+00> : vector<16x256xf32>
    %4 = tpu.matmul %2, %3, %cst {dimension_numbers = #tpu.dot_dimension_numbers<[1], [0], [0], [1], [0, 0, 1, 1], [], []>} : vector<16x64xbf16>, vector<64x256xbf16>, vector<16x256xf32> -> vector<16x256xf32>
    %c0_4 = arith.constant 0 : index
    %c0_5 = arith.constant 0 : index
    %5 = vector.load %arg3[%c0_4, %c0_5] : memref<16x256xf32, #tpu.memory_space<vmem>>, vector<16x256xf32>
    %6 = arith.mulf %4, %5 : vector<16x256xf32>
    %7 = vector.extract_strided_slice %6 {offsets = [0, 0], sizes = [16, 128], strides = [1, 1]} : vector<16x256xf32> to vector<16x128xf32>
    %8 = vector.extract_strided_slice %6 {offsets = [0, 128], sizes = [16, 128], strides = [1, 1]} : vector<16x256xf32> to vector<16x128xf32>
    %9 = arith.addf %7, %8 : vector<16x128xf32>
    %10 = vector.extract_strided_slice %9 {offsets = [0, 0], sizes = [16, 64], strides = [1, 1]} : vector<16x128xf32> to vector<16x64xf32>
    %11 = vector.extract_strided_slice %9 {offsets = [0, 64], sizes = [16, 32], strides = [1, 1]} : vector<16x128xf32> to vector<16x32xf32>
    %12 = vector.shape_cast %11 : vector<16x32xf32> to vector<2x8x32xf32>
    %13 = vector.extract_strided_slice %9 {offsets = [0, 96], sizes = [16, 32], strides = [1, 1]} : vector<16x128xf32> to vector<16x32xf32>
    %14 = vector.shape_cast %13 : vector<16x32xf32> to vector<2x8x32xf32>
    %c0_6 = arith.constant 0 : index
    %c0_7 = arith.constant 0 : index
    %c0_8 = arith.constant 0 : index
    %15 = vector.load %arg6[%c0_6, %c0_7, %c0_8] : memref<2x16x32xf32, #tpu.memory_space<vmem>>, vector<2x4x32xf32>
    %c0_9 = arith.constant 0 : index
    %c12 = arith.constant 12 : index
    %c0_10 = arith.constant 0 : index
    %16 = vector.load %arg6[%c0_9, %c12, %c0_10] : memref<2x16x32xf32, #tpu.memory_space<vmem>>, vector<2x4x32xf32>
    %17 = tpu.concatenate %15, %12, %16 in 1 : vector<2x4x32xf32>, vector<2x8x32xf32>, vector<2x4x32xf32> -> vector<2x16x32xf32>
    %c0_11 = arith.constant 0 : index
    %c0_12 = arith.constant 0 : index
    %c0_13 = arith.constant 0 : index
    %18 = vector.load %arg7[%c0_11, %c0_12, %c0_13] : memref<2x16x32xf32, #tpu.memory_space<vmem>>, vector<2x4x32xf32>
    %c0_14 = arith.constant 0 : index
    %c12_15 = arith.constant 12 : index
    %c0_16 = arith.constant 0 : index
    %19 = vector.load %arg7[%c0_14, %c12_15, %c0_16] : memref<2x16x32xf32, #tpu.memory_space<vmem>>, vector<2x4x32xf32>
    %20 = tpu.concatenate %18, %14, %19 in 1 : vector<2x4x32xf32>, vector<2x8x32xf32>, vector<2x4x32xf32> -> vector<2x16x32xf32>
    %c0_17 = arith.constant 0 : index
    %c0_18 = arith.constant 0 : index
    %c0_19 = arith.constant 0 : index
    %21 = vector.load %arg9[%c0_17, %c0_18, %c0_19] : memref<2x16x32xf32, #tpu.memory_space<vmem>>, vector<2x16x32xf32>
    tpu.vector_store %arg9[%c0_17, %c0_18, %c0_19], %17 {strides = array<i32>} : memref<2x16x32xf32, #tpu.memory_space<vmem>>, vector<2x16x32xf32>,
    %c0_20 = arith.constant 0 : index
    %c0_21 = arith.constant 0 : index
    %c0_22 = arith.constant 0 : index
    %22 = vector.load %arg10[%c0_20, %c0_21, %c0_22] : memref<2x16x32xf32, #tpu.memory_space<vmem>>, vector<2x16x32xf32>
    tpu.vector_store %arg10[%c0_20, %c0_21, %c0_22], %20 {strides = array<i32>} : memref<2x16x32xf32, #tpu.memory_space<vmem>>, vector<2x16x32xf32>,
    %c0_23 = arith.constant 0 : index
    %c0_24 = arith.constant 0 : index
    %23 = vector.load %arg4[%c0_23, %c0_24] : memref<32x64xbf16, #tpu.memory_space<vmem>>, vector<32x64xbf16>
    %c0_25 = arith.constant 0 : index
    %c0_26 = arith.constant 0 : index
    %24 = vector.load %arg5[%c0_25, %c0_26] : memref<64x64xf32, #tpu.memory_space<vmem>>, vector<64x64xf32>
    %25 = vector.shape_cast %17 : vector<2x16x32xf32> to vector<32x32xf32>
    %26 = arith.truncf %25 : vector<32x32xf32> to vector<32x32xbf16>
    %cst_27 = arith.constant dense<0.000000e+00> : vector<32x64xf32>
    %27 = tpu.matmul %26, %23, %cst_27 {dimension_numbers = #tpu.dot_dimension_numbers<[1], [0], [0], [1], [0, 0, 1, 1], [], []>} : vector<32x32xbf16>, vector<32x64xbf16>, vector<32x64xf32> -> vector<32x64xf32>
    %28 = vector.shape_cast %27 : vector<32x64xf32> to vector<2x16x64xf32>
    %29 = vector.shape_cast %20 : vector<2x16x32xf32> to vector<32x32xf32>
    %30 = arith.truncf %29 : vector<32x32xf32> to vector<32x32xbf16>
    %cst_28 = arith.constant dense<0.000000e+00> : vector<32x64xf32>
    %31 = tpu.matmul %30, %23, %cst_28 {dimension_numbers = #tpu.dot_dimension_numbers<[1], [0], [0], [1], [0, 0, 1, 1], [], []>} : vector<32x32xbf16>, vector<32x64xbf16>, vector<32x64xf32> -> vector<32x64xf32>
    %32 = vector.shape_cast %31 : vector<32x64xf32> to vector<2x16x64xf32>
    %33 = tpu.concatenate %28, %28, %28, %28 in 1 : vector<2x16x64xf32>, vector<2x16x64xf32>, vector<2x16x64xf32>, vector<2x16x64xf32> -> vector<2x64x64xf32>
    %34 = vector.shape_cast %24 : vector<64x64xf32> to vector<1x64x64xf32>
    %35 = vector.broadcast %34 : vector<1x64x64xf32> to vector<2x64x64xf32>
    %36 = arith.mulf %33, %35 : vector<2x64x64xf32>
    %37 = arith.truncf %36 : vector<2x64x64xf32> to vector<2x64x64xbf16>
    %38 = tpu.concatenate %32, %32, %32, %32 in 1 : vector<2x16x64xf32>, vector<2x16x64xf32>, vector<2x16x64xf32>, vector<2x16x64xf32> -> vector<2x64x64xf32>
    %39 = vector.shape_cast %24 : vector<64x64xf32> to vector<1x64x64xf32>
    %40 = vector.broadcast %39 : vector<1x64x64xf32> to vector<2x64x64xf32>
    %41 = arith.mulf %38, %40 : vector<2x64x64xf32>
    %42 = arith.truncf %41 : vector<2x64x64xf32> to vector<2x64x64xbf16>
    %43 = vector.shape_cast %10 : vector<16x64xf32> to vector<2x8x64xf32>
    %44 = arith.truncf %43 : vector<2x8x64xf32> to vector<2x8x64xbf16>
    "tpu.trace_start"() <{level = 10 : i32, message = "bld,bmd->blm"}> : () -> ()
    %cst_29 = arith.constant dense<0.000000e+00> : vector<2x8x64xf32>
    %45 = tpu.matmul %44, %37, %cst_29 {dimension_numbers = #tpu.dot_dimension_numbers<[2], [2], [1], [1], [0, 0, 0, 1, 1, 1], [0], [0]>} : vector<2x8x64xbf16>, vector<2x64x64xbf16>, vector<2x8x64xf32> -> vector<2x8x64xf32>
    "tpu.trace_stop"() : () -> ()
    %46 = tpu.iota {dimensions = array<i32: 0>} : vector<8x16xi32>
    %47 = tpu.iota {dimensions = array<i32: 1>} : vector<8x16xi32>
    %c4_i32 = arith.constant 4 : i32
    %48 = vector.broadcast %c4_i32 : i32 to vector<8x16xi32>
    %49 = arith.addi %46, %48 : vector<8x16xi32>
    %50 = arith.cmpi sle, %47, %49 : vector<8x16xi32>
    %cst_30 = arith.constant 0.000000e+00 : f32
    %cst_31 = arith.constant -1.000000e+30 : f32
    %51 = vector.broadcast %cst_30 : f32 to vector<8x16xf32>
    %52 = vector.broadcast %cst_31 : f32 to vector<8x16xf32>
    %53 = arith.select %50, %51, %52 : vector<8x16xi1>, vector<8x16xf32>
    %54 = tpu.concatenate %53, %53, %53, %53 in 1 : vector<8x16xf32>, vector<8x16xf32>, vector<8x16xf32>, vector<8x16xf32> -> vector<8x64xf32>
    %55 = vector.shape_cast %54 : vector<8x64xf32> to vector<1x8x64xf32>
    %56 = vector.broadcast %55 : vector<1x8x64xf32> to vector<2x8x64xf32>
    %57 = arith.addf %45, %56 : vector<2x8x64xf32>
    %cst_32 = arith.constant dense<0xFF800000> : vector<2x8xf32>
    %58 = vector.multi_reduction <maximumf>, %57, %cst_32 [2] : vector<2x8x64xf32> to vector<2x8xf32>
    %59 = vector.shape_cast %58 : vector<2x8xf32> to vector<2x8x1xf32>
    %60 = vector.broadcast %59 : vector<2x8x1xf32> to vector<2x8x64xf32>
    %61 = arith.subf %57, %60 : vector<2x8x64xf32>
    %62 = math.exp %61 : vector<2x8x64xf32>
    %63 = vector.shape_cast %62 : vector<2x8x64xf32> to vector<16x64xf32>
    %64 = arith.truncf %24 : vector<64x64xf32> to vector<64x64xbf16>
    %65 = arith.truncf %63 : vector<16x64xf32> to vector<16x64xbf16>
    %cst_33 = arith.constant dense<0.000000e+00> : vector<16x64xf32>
    %66 = tpu.matmul %65, %64, %cst_33 {dimension_numbers = #tpu.dot_dimension_numbers<[1], [0], [0], [1], [0, 0, 1, 1], [], []>} : vector<16x64xbf16>, vector<64x64xbf16>, vector<16x64xf32> -> vector<16x64xf32>
    %67 = tpu.reciprocal %66 {approx = true} : vector<16x64xf32> -> vector<16x64xf32>
    %68 = arith.mulf %63, %67 : vector<16x64xf32>
    %69 = vector.shape_cast %68 : vector<16x64xf32> to vector<2x8x64xf32>
    %70 = arith.truncf %69 : vector<2x8x64xf32> to vector<2x8x64xbf16>
    "tpu.trace_start"() <{level = 10 : i32, message = "blm,bmd->bld"}> : () -> ()
    %cst_34 = arith.constant dense<0.000000e+00> : vector<2x8x64xf32>
    %71 = tpu.matmul %70, %42, %cst_34 {dimension_numbers = #tpu.dot_dimension_numbers<[2], [1], [1], [2], [0, 0, 0, 1, 1, 2], [0], [0]>} : vector<2x8x64xbf16>, vector<2x64x64xbf16>, vector<2x8x64xf32> -> vector<2x8x64xf32>
    "tpu.trace_stop"() : () -> ()
    %72 = vector.shape_cast %71 : vector<2x8x64xf32> to vector<16x64xf32>
    %73 = arith.truncf %72 : vector<16x64xf32> to vector<16x64xbf16>
    %c0_35 = arith.constant 0 : index
    %c0_36 = arith.constant 0 : index
    %74 = vector.load %arg2[%c0_35, %c0_36] : memref<64x64xbf16, #tpu.memory_space<vmem>>, vector<64x64xbf16>
    %cst_37 = arith.constant dense<0.000000e+00> : vector<16x64xf32>
    %75 = tpu.matmul %73, %74, %cst_37 {dimension_numbers = #tpu.dot_dimension_numbers<[1], [0], [0], [1], [0, 0, 1, 1], [], []>} : vector<16x64xbf16>, vector<64x64xbf16>, vector<16x64xf32> -> vector<16x64xf32>
    %c0_38 = arith.constant 0 : index
    %c0_39 = arith.constant 0 : index
    %76 = vector.load %arg8[%c0_38, %c0_39] : memref<16x64xf32, #tpu.memory_space<vmem>>, vector<16x64xf32>
    tpu.vector_store %arg8[%c0_38, %c0_39], %75 {strides = array<i32>} : memref<16x64xf32, #tpu.memory_space<vmem>>, vector<16x64xf32>,
    return
  }
}

</mosaic_0001>

<bundles_post_ra>
// kernel: reasoner_attention.1
= control target key start
LH: loop header
LB: loop body
LE: loop exit
PB: predicated region body
PF: predicated region fallthrough
CT: control target
= control target key end

     0   :  { %16 = vsyncpa [#allocation3], 0  ;;  %s1584_s0 = inlined_call_operand.vmem [shape: f32[2,8,64], index: 0, kind: input, shape index: {}]   ;;  %s1585_s1 = inlined_call_operand.vmem [shape: bf16[64,256], index: 1, kind: input, shape index: {}]   ;;  %s1586_s2 = inlined_call_operand.hbm [shape: bf16[64,64], index: 2, kind: input, shape index: {}]   ;;  %s1587_s3 = inlined_call_operand.hbm [shape: f32[16,256], index: 3, kind: input, shape index: {}]   ;;  %s1588_s4 = inlined_call_operand.hbm [shape: bf16[32,64], index: 4, kind: input, shape index: {}]   ;;  %s1589_s5 = inlined_call_operand.hbm [shape: f32[64,64], index: 5, kind: input, shape index: {}]   ;;  %s1590_s6 = inlined_call_operand.vmem [shape: f32[2,16,32], index: 6, kind: input, shape index: {}, may-alias: {6,9}]   ;;  %s1591_s7 = inlined_call_operand.vmem [shape: f32[2,16,32], index: 7, kind: input, shape index: {}, may-alias: {7,10}]   ;;  %s1592_s8 = inlined_call_operand.hbm [shape: f32[16,64], index: 8, kind: output, shape index: {0}]   ;;  %s1593_s9 = inlined_call_operand.vmem [shape: f32[2,16,32], index: 9, kind: output, shape index: {1}, may-alias: {6,9}]   ;;  %s1594_s10 = inlined_call_operand.vmem [shape: f32[2,16,32], index: 10, kind: output, shape index: {2}, may-alias: {7,10}]  }
   0x1   :  { %17 = vsyncpa [#allocation6], 0 }
   0x2   :  { %18 = vsyncpa [#allocation9], 0 }
   0x3   :  { %19 = vsyncpa [#allocation4], 0  ;;  %s1142_s13 = smov [#allocation5]   ;;  %s1024_s17 = scalar_lea.hbm %s1587_s3, 512 }
   0x4   :  { %s41_s14 = sshll.u32 %s1142_s13, 4  ;;  %p1025_p0 = scmp.ne.s32.totalorder %s1587_s3, %s1024_s17  ;;  %s42_s14 = int_to_ptr.vmem [resolvable:$true] %s41_s14 }
   0x5   :  { %p1028_p1 = scmp.lt.u32.totalorder %s1024_s17, %s1587_s3 }
   0x7   :  { %p1030_p2 = pnand %p1028_p1, %p1025_p0 }
   0x9   :  { %1033 = shalt.err (!%p1030_p2)
}
   0xa   :  { %s1034_s22 = scalar_lea.vmem %s42_s14, 512  ;;  %p1039_p4 = scmp.lt.s32.totalorder %s42_s14, %s42_s14 }
   0xb   :  { %p1035_p3 = scmp.ne.s32.totalorder %s42_s14, %s1034_s22  ;;  %p1040_p5 = scmp.lt.s32.totalorder %s1034_s22, %s1034_s22 }
   0xd   :  { %p1041_p6 = por %p1040_p5, %p1039_p4 }
   0xf   :  { %p1042_p7 = pnand %p1041_p6, %p1035_p3 }
  0x11   :  { %1045 = shalt.err (!%p1042_p7)
}
  0x12   :  { %s1143_s23 = smov 256   ;;  %s1144_s24 = smov 16  }
  0x13   :  { %47 = dma.hbm_to_vmem [thread:$0]  %s1587_s3, 512, %s42_s14, [#allocation6], %s1143_s23, %s1143_s23, %s1144_s24  }
  0x14   :  { %s1145_s27 = smov [#allocation2]   ;;  %s1046_s11 = scalar_lea.hbm %s1586_s2, 512 }
  0x15   :  { %s29_s28 = sshll.u32 %s1145_s27, 4  ;;  %p1047_p8 = scmp.ne.s32.totalorder %s1586_s2, %s1046_s11  ;;  %s30_s28 = int_to_ptr.vmem [resolvable:$true] %s29_s28 }
  0x16   :  { %p1050_p9 = scmp.lt.u32.totalorder %s1046_s11, %s1586_s2 }
  0x18   :  { %p1052_p10 = pnand %p1050_p9, %p1047_p8 }
  0x1a   :  { %1055 = shalt.err (!%p1052_p10)
}
  0x1b   :  { %s1056_s17 = scalar_lea.vmem %s30_s28, 512  ;;  %p1061_p12 = scmp.lt.s32.totalorder %s30_s28, %s30_s28 }
  0x1c   :  { %p1057_p11 = scmp.ne.s32.totalorder %s30_s28, %s1056_s17  ;;  %p1062_p13 = scmp.lt.s32.totalorder %s1056_s17, %s1056_s17 }
  0x1e   :  { %p1063_p0 = por %p1062_p13, %p1061_p12 }
  0x20   :  { %p1064_p1 = pnand %p1063_p0, %p1057_p11 }
  0x22   :  { %1067 = shalt.err (!%p1064_p1)
}
  0x23   :  { %s1146_s3 = smov 64   ;;  %s1147_s14 = smov 4  }
  0x24   :  { %35 = dma.hbm_to_vmem [thread:$0]  %s1586_s2, 512, %s30_s28, [#allocation3], %s1146_s3, %s1146_s3, %s1147_s14  }
  0x25   :  { %s1148_s20 = smov [#allocation7]   ;;  %s1149_s22 = smov [#allocation8]  }
  0x26   :  { %s53_s21 = sshll.u32 %s1148_s20, 4  ;;  %s65_s23 = sshll.u32 %s1149_s22, 4  ;;  %s54_s21 = int_to_ptr.vmem [resolvable:$true] %s53_s21  ;;  %s1241_s23 = int_to_ptr.vmem [resolvable:$true] %s65_s23 }
  0x27   :  { %s1068_s27 = scalar_lea.hbm %s1588_s4, 256 }
  0x28   :  { %p1069_p2 = scmp.ne.s32.totalorder %s1588_s4, %s1068_s27  ;;  %p1072_p3 = scmp.lt.u32.totalorder %s1068_s27, %s1588_s4 }
  0x2a   :  { %p1074_p4 = pnand %p1072_p3, %p1069_p2 }
  0x2c   :  { %1077 = shalt.err (!%p1074_p4)
}
  0x2d   :  { %s1078_s2 = scalar_lea.vmem %s54_s21, 256  ;;  %p1083_p6 = scmp.lt.s32.totalorder %s54_s21, %s54_s21 }
  0x2e   :  { %p1079_p5 = scmp.ne.s32.totalorder %s54_s21, %s1078_s2  ;;  %p1084_p7 = scmp.lt.s32.totalorder %s1078_s2, %s1078_s2 }
  0x30   :  { %p1085_p8 = por %p1084_p7, %p1083_p6 }
  0x32   :  { %p1086_p9 = pnand %p1085_p8, %p1079_p5 }
  0x34   :  { %1089 = shalt.err (!%p1086_p9)
}
  0x35   :  { %59 = dma.hbm_to_vmem [thread:$0]  %s1588_s4, 256, %s54_s21, [#allocation6], %s1146_s3, %s1146_s3, %s1147_s14  }
  0x36   :  { %s1090_s17 = scalar_lea.hbm %s1589_s5, 1024 }
  0x37   :  { %p1091_p10 = scmp.ne.s32.totalorder %s1589_s5, %s1090_s17  ;;  %p1094_p11 = scmp.lt.u32.totalorder %s1090_s17, %s1589_s5 }
  0x39   :  { %p1096_p12 = pnand %p1094_p11, %p1091_p10 }
  0x3b   :  { %1099 = shalt.err (!%p1096_p12)
}
  0x3c   :  { %s1100_s25 = scalar_lea.vmem %s1241_s23, 1024  ;;  %p1105_p0 = scmp.lt.s32.totalorder %s1241_s23, %s1241_s23 }
  0x3d   :  { %p1101_p13 = scmp.ne.s32.totalorder %s1241_s23, %s1100_s25  ;;  %p1106_p1 = scmp.lt.s32.totalorder %s1100_s25, %s1100_s25 }
  0x3f   :  { %p1107_p2 = por %p1106_p1, %p1105_p0 }
  0x41   :  { %p1108_p3 = pnand %p1107_p2, %p1101_p13 }
  0x43   :  { %1111 = shalt.err (!%p1108_p3)
}
  0x44   :  { %s1150_s4 = smov 128   ;;  %s1151_s14 = smov 8  }
  0x45   :  { %71 = dma.hbm_to_vmem [thread:$0]  %s1589_s5, 1024, %s1241_s23, [#allocation9], %s1150_s4, %s1150_s4, %s1151_s14  }
  0x46   :  { %1134 = dma.done.wait [#allocation3], 512  }
  0x47   :  { %1135 = vsyncadd [#allocation3], 4294966784 }
  0x48   :  { %1136 = dma.done.wait [#allocation6], 768  }
  0x49   :  { %1137 = vsyncadd [#allocation6], 4294966528 }
  0x4a   :  { %1138 = dma.done.wait [#allocation9], 1024  }
  0x4b   :  { %1139 = vsyncadd [#allocation9], 4294966272  ;;  %v1152_v0 = vmov 0   ;;  %v998_v1 = vld [vmem:[%s1585_s1 + $0x4] ss:$8 sps:$4 sm:$0xff]   ;;  %vm140_vm0 = vcmask 523264   ;;  %v439_v59 = vlaneseq }
  0x4c   :  { %176 = vmatprep.mubr.bf16.mxu0 %v1152_v0  ;;  %v1000_v2 = vld [vmem:[%s1585_s1] ss:$8 sps:$4 sm:$0xff]   ;;  %144 = vmatprep.subr.bf16.mxu0 %v998_v1  ;;  %v1001_v3 = vld [vmem:[%s1585_s1 + $0x14] ss:$8 sps:$4 sm:$0xff]   ;;  %v1003_v4 = vld [vmem:[%s1585_s1 + $0x10] ss:$8 sps:$4 sm:$0xff]  }
  0x4d   :  { %145 = vmatpush1.bf16.msra.mxu0 %v1000_v2  ;;  %v1004_v5 = vld [vmem:[%s1585_s1 + $0x24] ss:$8 sps:$4 sm:$0xff]   ;;  %v1006_v6 = vld [vmem:[%s1585_s1 + $0x20] ss:$8 sps:$4 sm:$0xff]   ;;  %v1007_v7 = vld [vmem:[%s1585_s1 + $0x34] ss:$8 sps:$4 sm:$0xff]  }
  0x4e   :  { %146 = vmatprep.subr.bf16.mxu0 %v1001_v3  ;;  %v1009_v8 = vld [vmem:[%s1585_s1 + $0x30] ss:$8 sps:$4 sm:$0xff]   ;;  %v89_v9 = vld [vmem:[%s1584_s0] sm:$0xff]  ;;  %v90_v10 = vld [vmem:[%s1584_s0 + $0x8] sm:$0xff]  ;;  %s1153_s0 = smov 32   ;;  %vm217_vm1 = vcmask 1043456  }
  0x4f   :  { %v91_v11 = vpack.c.bf16 %v90_v10, %v89_v9  ;;  %v1308_v12 = vld [vmem:[#allocation7] sm:$0xff]   ;;  %v1312_v13 = vld [vmem:[#allocation7 + $0x8] sm:$0xff]   ;;  %v189_v17 = vld [vmem:[#allocation5 + $0x10] sm:$0xff]  ;;  %vm242_vm2 = vcmask 261120   ;;  %v1154_v58 = vmov 0.0   ;;  %vm1155_vm3 = vmmov 0  }
  0x50   :  { %893 = vmatprep.subr.bf16.mxu1 %v1308_v12  ;;  %v187_v14 = vld [vmem:[#allocation5] sm:$0xff]  ;;  %v188_v15 = vld [vmem:[#allocation5 + $0x8] sm:$0xff]  ;;  %v190_v20 = vld [vmem:[#allocation5 + $0x18] sm:$0xff]  ;;  %v440_v60 = vshrl.u32 %v439_v59, 7  ;;  %v442_v61 = vand.u32 127, %v439_v59  ;;  %vm456_vm5 = vcmask 130048  }
  0x51   :  { %147 = vmatpush1.bf16.msra.mxu0 %v1003_v4  ;;  %894 = vmatpush3.bf16.msra.mxu1 %v1308_v12  ;;  %v224_v30 = vld [vmem:[%s1591_s7 + $0xc] sm:$0xf]  ;;  %v225_v34 = vld [vmem:[%s1591_s7 + $0x1c] sm:$0xf]  ;;  %v222_v36 = vld [vmem:[%s1591_s7] sm:$0xf] }
  0x52   :  { %148 = vmatprep.subr.bf16.mxu0 %v1004_v5  ;;  %895 = vmatprep.subr.bf16.mxu1 %v1312_v13  ;;  %v199_v31 = vld [vmem:[%s1590_s6 + $0xc] sm:$0xf]  ;;  %v234_v32 = vrot.slane %v224_v30, 4  ;;  %v200_v35 = vld [vmem:[%s1590_s6 + $0x1c] sm:$0xf]  ;;  %v235_v40 = vrot.slane %v225_v34, 4 }
  0x53   :  { %v213_v33 = vrot.slane %v199_v31, 4  ;;  %v197_v37 = vld [vmem:[%s1590_s6] sm:$0xf]  ;;  %v214_v41 = vrot.slane %v200_v35, 4  ;;  %v443_v62 = vadd.s32 4, %v440_v60  ;;  %v1411_v1 = vld [vmem:[#allocation8] sm:$0xff] }
  0x54   :  { %v1156_v63 = vmov -1e+30   ;;  %v1413_v2 = vld [vmem:[#allocation8 + $0x10] sm:$0xff]  ;;  %v1415_v3 = vld [vmem:[#allocation8 + $0x20] sm:$0xff]  ;;  %v1419_v5 = vld [vmem:[#allocation8 + $0x8] sm:$0xff]  ;;  %vm459_vm6 = vcmask 392192  }
  0x55   :  { %149 = vmatpush1.bf16.msra.mxu0 %v1006_v6  ;;  %896 = vmatpush3.bf16.msra.mxu1 %v1312_v13  ;;  %vm444_vm4 = vcmp.le.s32.totalorder %v442_v61, %v443_v62  ;;  %v1417_v4 = vld [vmem:[#allocation8 + $0x30] sm:$0xff]  ;;  %v1425_v9 = vld [vmem:[#allocation8 + $0x38] sm:$0xff] }
  0x56   :  { %150 = vmatprep.subr.bf16.mxu0 %v1007_v7  ;;  %901 = vmatprep.subr.bf16.mxu1 %v1308_v12  ;;  %v1404_v0 = vsel %vm444_vm4, 0.0, %v1156_v63  ;;  %v1421_v7 = vld [vmem:[#allocation8 + $0x18] sm:$0xff] }
  0x59   :  { %151 = vmatpush1.bf16.msra.mxu0 %v1009_v8  ;;  %v1423_v8 = vld [vmem:[#allocation8 + $0x28] sm:$0xff] }
  0x5a   :  { %909 = vmatprep.subr.bf16.mxu0 %v1154_v58 }
  0x5c   :  { %838 = vmatmul.mubr.msk.bf16.vlgmr.msra.gmra.mrb[0].mxu0 %vm140_vm0, %v91_v11 }
  0x5d   :  { %917 = vmatprep.mubr.msk.bf16.mxu0 %vm1155_vm3, %v1154_v58 }
 0x12f   :  { %v178_v16 = vpop.f32.mrb[0].mxu0 }
 0x130   :  { %v191_v18 = vmul.f32 %v187_v14, %v178_v16  ;;  %v180_v19 = vpop.f32.mrb[1].mxu0 }
 0x131   :  { %v192_v21 = vmul.f32 %v188_v15, %v180_v19  ;;  %v182_v22 = vpop.f32.mrb[2].mxu0 }
 0x132   :  { %v193_v23 = vmul.f32 %v189_v17, %v182_v22  ;;  %v184_v24 = vpop.f32.mrb[3].mxu0 }
 0x133   :  { %v1317_v25 = vadd.f32 %v192_v21, %v191_v18  ;;  %v194_v26 = vmul.f32 %v190_v20, %v184_v24 }
 0x135   :  { %v1319_v27 = vadd.f32 %v194_v26, %v193_v23  ;;  %v203_v28 = vrot.slane %v1317_v25, 4 }
 0x137   :  { %226 = vrot.lane.b32.xlu1 %v203_v28, %s1153_s0  ;;  %205 = vrot.lane.b32.xlu0 %v203_v28, %s1146_s3  ;;  %v204_v29 = vrot.slane %v1319_v27, 4 }
 0x13b   :  { %228 = vrot.lane.b32.xlu1 %v204_v29, %s1153_s0  ;;  %207 = vrot.lane.b32.xlu0 %v204_v29, %s1146_s3 }
 0x13f   :  { %447 = vrot.lane.b32.xlu0 %v1404_v0, %s1144_s24  ;;  %450 = vrot.lane.b32.xlu1 %v1404_v0, %s1153_s0 }
 0x1a9   :  { %v227_v38 = vpop.permute.xlu1 %226  ;;  %v206_v39 = vpop.permute.xlu0 %205 }
 0x1aa   :  { %v238_v42 = vsel %vm217_vm1, %v222_v36, %v227_v38  ;;  %v240_v43 = vsel %vm217_vm1, %v227_v38, %v234_v32  ;;  %v218_v44 = vsel %vm217_vm1, %v197_v37, %v206_v39  ;;  %v220_v45 = vsel %vm217_vm1, %v206_v39, %v213_v33 }
 0x1ab   :  { %247 = vst.msk [vmem:[%s1594_s10] sm:$0xff] %vm242_vm2, %v238_v42  ;;  %248 = vst.msk [vmem:[%s1594_s10 + $0x8] sm:$0xff] %vm242_vm2, %v240_v43  ;;  %v263_v46 = vpack.c.bf16 %v220_v45, %v218_v44  ;;  %v332_v56 = vpack.c.bf16 %v240_v43, %v238_v42 }
 0x1ac   :  { %243 = vst.msk [vmem:[%s1593_s9] sm:$0xff] %vm242_vm2, %v218_v44  ;;  %244 = vst.msk [vmem:[%s1593_s9 + $0x8] sm:$0xff] %vm242_vm2, %v220_v45 }
 0x1ad   :  { %897 = vmatprep.mubr.msk.bf16.mxu1 %vm242_vm2, %v263_v46  ;;  %v229_v49 = vpop.permute.xlu1 %228  ;;  %v208_v50 = vpop.permute.xlu0 %207 }
 0x1ae   :  { %v241_v52 = vsel %vm217_vm1, %v229_v49, %v235_v40  ;;  %v221_v54 = vsel %vm217_vm1, %v208_v50, %v214_v41 }
 0x1b2   :  { %v223_v47 = vld [vmem:[%s1591_s7 + $0x10] sm:$0xf] }
 0x1b3   :  { %v198_v48 = vld [vmem:[%s1590_s6 + $0x10] sm:$0xf]  ;;  %v239_v51 = vsel %vm217_vm1, %v223_v47, %v229_v49  ;;  %250 = vst.msk [vmem:[%s1594_s10 + $0x18] sm:$0xff] %vm242_vm2, %v241_v52 }
 0x1b4   :  { %v219_v53 = vsel %vm217_vm1, %v198_v48, %v208_v50  ;;  %249 = vst.msk [vmem:[%s1594_s10 + $0x10] sm:$0xff] %vm242_vm2, %v239_v51  ;;  %246 = vst.msk [vmem:[%s1593_s9 + $0x18] sm:$0xff] %vm242_vm2, %v221_v54  ;;  %v333_v57 = vpack.c.bf16 %v241_v52, %v239_v51  ;;  %s1158_s10 = smov [#allocation10]  }
 0x1b5   :  { %245 = vst.msk [vmem:[%s1593_s9 + $0x10] sm:$0xff] %vm242_vm2, %v219_v53  ;;  %v264_v55 = vpack.c.bf16 %v221_v54, %v219_v53  ;;  %s1157_s9 = smov 48   ;;  %s808_s24 = sshll.u32 %s1158_s10, 4  ;;  %s809_s24 = int_to_ptr.vmem [resolvable:$true] %s808_s24 }
 0x1b6   :  { %453 = vrot.lane.b32.xlu0 %v1404_v0, %s1157_s9  ;;  %s1112_s0 = scalar_lea.vmem %s809_s24, 256  ;;  %p1117_p5 = scmp.lt.s32.totalorder %s809_s24, %s809_s24 }
 0x1b7   :  { %898 = vmatmul.mubr.msk.bf16.vlgmr.msra.gmra.mrb[0].mxu1 %vm242_vm2, %v264_v55  ;;  %p1113_p4 = scmp.ne.s32.totalorder %s809_s24, %s1112_s0  ;;  %p1118_p6 = scmp.lt.s32.totalorder %s1112_s0, %s1112_s0 }
 0x1b8   :  { %902 = vmatpush3.bf16.msra.mxu1 %v1308_v12  ;;  %905 = vmatprep.mubr.msk.bf16.mxu1 %vm242_vm2, %v332_v56 }
 0x1b9   :  { %903 = vmatprep.subr.bf16.mxu1 %v1312_v13  ;;  %p1119_p7 = por %p1118_p6, %p1117_p5 }
 0x1bb   :  { %p1120_p8 = pnand %p1119_p7, %p1113_p4 }
 0x1bc   :  { %904 = vmatpush3.bf16.msra.mxu1 %v1312_v13 }
 0x1bd   :  { %921 = vmatprep.subr.bf16.mxu1 %v1154_v58 }
 0x1bf   :  { %906 = vmatmul.mubr.msk.bf16.vlgmr.msra.gmra.mrb[4].mxu1 %vm242_vm2, %v333_v57 }
 0x1c0   :  { %929 = vmatprep.mubr.msk.bf16.mxu1 %vm1155_vm3, %v1154_v58 }
 0x28a   :  { %v899_v6 = vpop.f32.mrb[0].mxu1 }
 0x28b   :  { %v397_v10 = vmul.f32 %v899_v6, %v1411_v1  ;;  %v399_v11 = vmul.f32 %v899_v6, %v1413_v2  ;;  %v1430_v12 = vmul.f32 %v899_v6, %v1415_v3  ;;  %v1433_v13 = vmul.f32 %v899_v6, %v1417_v4  ;;  %v317_v14 = vpop.f32.mrb[1].mxu1 }
 0x28c   :  { %v389_v15 = vmul.f32 %v317_v14, %v1411_v1  ;;  %v391_v16 = vmul.f32 %v317_v14, %v1413_v2  ;;  %v1438_v17 = vmul.f32 %v317_v14, %v1415_v3  ;;  %v1441_v18 = vmul.f32 %v317_v14, %v1417_v4  ;;  %v900_v19 = vpop.f32.mrb[2].mxu1 }
 0x28d   :  { %v398_v20 = vmul.f32 %v900_v19, %v1419_v5  ;;  %v400_v21 = vmul.f32 %v900_v19, %v1421_v7  ;;  %v402_v22 = vmul.f32 %v900_v19, %v1423_v8  ;;  %v404_v23 = vmul.f32 %v900_v19, %v1425_v9  ;;  %v320_v24 = vpop.f32.mrb[3].mxu1 }
 0x28e   :  { %v390_v26 = vmul.f32 %v320_v24, %v1419_v5  ;;  %v392_v28 = vmul.f32 %v320_v24, %v1421_v7  ;;  %v394_v29 = vmul.f32 %v320_v24, %v1423_v8  ;;  %v396_v30 = vmul.f32 %v320_v24, %v1425_v9 }
 0x28f   :  { %v409_v31 = vpack.c.bf16 %v398_v20, %v397_v10  ;;  %v410_v32 = vpack.c.bf16 %v400_v21, %v399_v11  ;;  %v411_v33 = vpack.c.bf16 %v402_v22, %v1430_v12  ;;  %v412_v34 = vpack.c.bf16 %v404_v23, %v1433_v13  ;;  %v451_v23 = vpop.permute.xlu1 %450 }
 0x290   :  { %v405_v35 = vpack.c.bf16 %v390_v26, %v389_v15  ;;  %v406_v36 = vpack.c.bf16 %v392_v28, %v391_v16  ;;  %v407_v37 = vpack.c.bf16 %v394_v29, %v1438_v17  ;;  %v408_v38 = vpack.c.bf16 %v396_v30, %v1441_v18 }
 0x291   :  { %v520_v39 = vsel %vm140_vm0, %v409_v31, 0  ;;  %v523_v15 = vsel %vm140_vm0, %v410_v32, 0  ;;  %v526_v17 = vsel %vm140_vm0, %v411_v33, 0  ;;  %v529_v19 = vsel %vm140_vm0, %v412_v34, 0 }
 0x292   :  { %v907_v40 = vpop.f32.mrb[4].mxu1  ;;  %922 = vmatpush3.bf16.xpose.msra.mxu1 %v520_v39  ;;  %v465_v41 = vsel %vm140_vm0, %v405_v35, 0  ;;  %v468_v16 = vsel %vm140_vm0, %v406_v36, 0  ;;  %v471_v18 = vsel %vm140_vm0, %v407_v37, 0  ;;  %v474_v20 = vsel %vm140_vm0, %v408_v38, 0 }
 0x293   :  { %v1458_v42 = vmul.f32 %v907_v40, %v1411_v1  ;;  %v1461_v43 = vmul.f32 %v907_v40, %v1413_v2  ;;  %v1464_v44 = vmul.f32 %v907_v40, %v1415_v3  ;;  %v1467_v45 = vmul.f32 %v907_v40, %v1417_v4  ;;  %v374_v46 = vpop.f32.mrb[5].mxu1  ;;  %910 = vmatpush3.bf16.xpose.msra.mxu0 %v465_v41 }
 0x294   :  { %v413_v47 = vmul.f32 %v374_v46, %v1411_v1  ;;  %v415_v48 = vmul.f32 %v374_v46, %v1413_v2  ;;  %v417_v49 = vmul.f32 %v374_v46, %v1415_v3  ;;  %v419_v50 = vmul.f32 %v374_v46, %v1417_v4  ;;  %v908_v51 = vpop.f32.mrb[6].mxu1  ;;  %923 = vmatprep.subr.bf16.mxu1 %v1154_v58 }
 0x295   :  { %v1475_v52 = vmul.f32 %v908_v51, %v1419_v5  ;;  %v1478_v53 = vmul.f32 %v908_v51, %v1421_v7  ;;  %v1481_v54 = vmul.f32 %v908_v51, %v1423_v8  ;;  %v1484_v55 = vmul.f32 %v908_v51, %v1425_v9  ;;  %v377_v56 = vpop.f32.mrb[7].mxu1  ;;  %911 = vmatprep.subr.bf16.mxu0 %v1154_v58 }
 0x296   :  { %v414_v57 = vmul.f32 %v377_v56, %v1419_v5  ;;  %v416_v59 = vmul.f32 %v377_v56, %v1421_v7  ;;  %v418_v60 = vmul.f32 %v377_v56, %v1423_v8  ;;  %v420_v61 = vmul.f32 %v377_v56, %v1425_v9  ;;  %v1012_v56 = vld [vmem:[#allocation2] sm:$0xff]  }
 0x297   :  { %v433_v62 = vpack.c.bf16 %v1475_v52, %v1458_v42  ;;  %v434_v63 = vpack.c.bf16 %v1478_v53, %v1461_v43  ;;  %v435_v6 = vpack.c.bf16 %v1481_v54, %v1464_v44  ;;  %v436_v10 = vpack.c.bf16 %v1484_v55, %v1467_v45  ;;  %v1013_v54 = vld [vmem:[#allocation2 + $0x8] sm:$0xff]   ;;  %v1014_v45 = vld [vmem:[#allocation2 + $0x10] sm:$0xff]   ;;  %v1015_v55 = vld [vmem:[#allocation2 + $0x18] sm:$0xff]  }
 0x298   :  { %v429_v11 = vpack.c.bf16 %v414_v57, %v413_v47  ;;  %v430_v12 = vpack.c.bf16 %v416_v59, %v415_v48  ;;  %v431_v13 = vpack.c.bf16 %v418_v60, %v417_v49  ;;  %v432_v14 = vpack.c.bf16 %v420_v61, %v419_v50 }
 0x299   :  { %v438_v21 = vpack.c.bf16 %v1319_v27, %v1319_v27  ;;  %v437_v22 = vpack.c.bf16 %v1317_v25, %v1317_v25  ;;  %v448_v25 = vpop.permute.xlu0 %447  ;;  %v583_v40 = vpack.c.bf16 %v1419_v5, %v1411_v1  ;;  %v584_v41 = vpack.c.bf16 %v1421_v7, %v1413_v2 }
 0x29a   :  { %924 = vmatpush3.bf16.xpose.msra.mxu1 %v523_v15  ;;  %v457_v27 = vsel %vm456_vm5, %v1404_v0, %v448_v25  ;;  %v585_v46 = vpack.c.bf16 %v1423_v8, %v1415_v3  ;;  %v586_v47 = vpack.c.bf16 %v1425_v9, %v1417_v4 }
 0x29b   :  { %912 = vmatpush3.bf16.xpose.msra.mxu0 %v468_v16  ;;  %925 = vmatprep.subr.bf16.mxu1 %v1154_v58  ;;  %v458_v24 = vsel %vm242_vm2, %v457_v27, %v451_v23 }
 0x29c   :  { %913 = vmatprep.subr.bf16.mxu0 %v1154_v58 }
 0x29d   :  { %v454_v26 = vpop.permute.xlu0 %453 }
 0x29e   :  { %v460_v28 = vsel %vm459_vm6, %v458_v24, %v454_v26 }
 0x2a2   :  { %926 = vmatpush3.bf16.xpose.msra.mxu1 %v526_v17 }
 0x2a3   :  { %914 = vmatpush3.bf16.xpose.msra.mxu0 %v471_v18  ;;  %927 = vmatprep.subr.bf16.mxu1 %v1154_v58 }
 0x2a4   :  { %915 = vmatprep.subr.bf16.mxu0 %v1154_v58 }
 0x2aa   :  { %928 = vmatpush3.bf16.xpose.msra.mxu1 %v529_v19 }
 0x2ab   :  { %916 = vmatpush3.bf16.xpose.msra.mxu0 %v474_v20  ;;  %945 = vmatprep.subr.bf16.mxu1 %v1154_v58 }
 0x2ac   :  { %933 = vmatprep.subr.bf16.mxu0 %v1154_v58 }
 0x2b1   :  { %930 = vmatmul.mubr.msk.bf16.vlgmr.msra.gmra.mrb[8].mxu1 %vm140_vm0, %v438_v21 }
 0x2b2   :  { %918 = vmatmul.mubr.msk.bf16.vlgmr.msra.gmra.mrb[4].mxu0 %vm140_vm0, %v437_v22  ;;  %946 = vmatpush3.bf16.msra.mxu1 %v429_v11 }
 0x2b3   :  { %947 = vmatprep.subr.bf16.mxu1 %v1154_v58  ;;  %941 = vmatprep.mubr.msk.bf16.mxu0 %vm1155_vm3, %v1154_v58 }
 0x2b4   :  { %953 = vmatprep.mubr.msk.bf16.mxu1 %vm1155_vm3, %v1154_v58  ;;  %934 = vmatpush3.bf16.msra.mxu0 %v583_v40 }
 0x2b5   :  { %935 = vmatprep.subr.bf16.mxu0 %v1154_v58 }
 0x2b6   :  { %948 = vmatpush3.bf16.msra.mxu1 %v430_v12 }
 0x2b7   :  { %949 = vmatprep.subr.bf16.mxu1 %v1154_v58 }
 0x2b8   :  { %936 = vmatpush3.bf16.msra.mxu0 %v584_v41 }
 0x2b9   :  { %937 = vmatprep.subr.bf16.mxu0 %v1154_v58 }
 0x2ba   :  { %950 = vmatpush3.bf16.msra.mxu1 %v431_v13 }
 0x2bb   :  { %951 = vmatprep.subr.bf16.mxu1 %v1154_v58 }
 0x2bc   :  { %938 = vmatpush3.bf16.msra.mxu0 %v585_v46 }
 0x2bd   :  { %939 = vmatprep.subr.bf16.mxu0 %v1154_v58 }
 0x2be   :  { %952 = vmatpush3.bf16.msra.mxu1 %v432_v14 }
 0x2bf   :  { %969 = vmatprep.subr.bf16.mxu1 %v1154_v58 }
 0x2c0   :  { %940 = vmatpush3.bf16.msra.mxu0 %v586_v47 }
 0x2c1   :  { %957 = vmatprep.subr.bf16.mxu0 %v1154_v58 }
 0x384   :  { %v565_v29 = vpop.f32.mrb[8].mxu1 }
 0x385   :  { %v566_v30 = vadd.f32 %v565_v29, %v460_v28  ;;  %v510_v31 = vpop.f32.mrb[4].mxu0  ;;  %v931_v32 = vpop.f32.mrb[9].mxu1 }
 0x386   :  { %v511_v33 = vadd.f32 %v510_v31, %v460_v28  ;;  %v919_v34 = vpop.f32.mrb[5].mxu0  ;;  %v568_v35 = vpop.f32.mrb[10].mxu1 }
 0x387   :  { %v513_v36 = vpop.f32.mrb[6].mxu0  ;;  %v932_v37 = vpop.f32.mrb[11].mxu1  ;;  %v574_v38 = vsel %vm140_vm0, %v566_v30, -inf }
 0x388   :  { %v920_v39 = vpop.f32.mrb[7].mxu0  ;;  %575 = vmax.xlane.f32.xlu0 %v574_v38  ;;  %v571_v0 = vsel %vm140_vm0, %v511_v33, -inf }
 0x389   :  { %572 = vmax.xlane.f32.xlu1 %v571_v0 }
 0x415   :  { %v576_v1 = vpop.xlane.xlu0 %575 }
 0x416   :  { %v578_v5 = vsub.f32 %v566_v30, %v576_v1  ;;  %v573_v48 = vpop.xlane.xlu1 %572 }
 0x417   :  { %v577_v49 = vsub.f32 %v511_v33, %v573_v48 }
 0x418   :  { %v581_v2 = vmul.f32 1.442695, %v578_v5 }
 0x419   :  { %v579_v7 = vmul.f32 1.442695, %v577_v49 }
 0x41a   :  { %1016 = vpow2.f32 %v581_v2 }
 0x41b   :  { %1018 = vpow2.f32 %v579_v7 }
 0x424   :  { %v1017_v3 = vpop.eup %1016 }
 0x425   :  { %v1019_v8 = vpop.eup %1018 }
 0x426   :  { %v587_v50 = vpack.c.bf16 %v1017_v3, %v1019_v8 }
 0x428   :  { %942 = vmatmul.mubr.msk.bf16.vlgmr.msra.gmra.mrb[8].mxu0 %vm140_vm0, %v587_v50 }
 0x429   :  { %958 = vmatpush3.bf16.msra.mxu0 %v433_v62  ;;  %965 = vmatprep.mubr.msk.bf16.mxu0 %vm1155_vm3, %v1154_v58 }
 0x42a   :  { %959 = vmatprep.subr.bf16.mxu0 %v1154_v58 }
 0x42d   :  { %960 = vmatpush3.bf16.msra.mxu0 %v434_v63 }
 0x42e   :  { %961 = vmatprep.subr.bf16.mxu0 %v1154_v58 }
 0x431   :  { %962 = vmatpush3.bf16.msra.mxu0 %v435_v6 }
 0x432   :  { %963 = vmatprep.subr.bf16.mxu0 %v1154_v58 }
 0x435   :  { %964 = vmatpush3.bf16.msra.mxu0 %v436_v10 }
 0x4fb   :  { %v625_v4 = vpop.f32.mrb[8].mxu0 }
 0x4fc   :  { %1020 = vrcp.f32 %v625_v4  ;;  %v943_v9 = vpop.f32.mrb[9].mxu0 }
 0x4fd   :  { %v628_v42 = vpop.f32.mrb[10].mxu0 }
 0x4fe   :  { %1022 = vrcp.f32 %v628_v42  ;;  %v944_v51 = vpop.f32.mrb[11].mxu0 }
 0x506   :  { %v1021_v43 = vpop.eup %1020 }
 0x507   :  { %v634_v52 = vmul.f32 %v1021_v43, %v1019_v8 }
 0x508   :  { %v1023_v53 = vpop.eup %1022 }
 0x509   :  { %v635_v57 = vmul.f32 %v1023_v53, %v1017_v3  ;;  %v636_v59 = vpack.c.bf16 %v634_v52, %v634_v52 }
 0x50b   :  { %954 = vmatmul.mubr.msk.bf16.vlgmr.msra.gmra.mrb[12].mxu1 %vm140_vm0, %v636_v59  ;;  %v637_v44 = vpack.c.bf16 %v635_v57, %v635_v57 }
 0x50c   :  { %970 = vmatpush3.bf16.msra.mxu1 %v1012_v56  ;;  %977 = vmatprep.mubr.msk.bf16.mxu1 %vm1155_vm3, %v1154_v58 }
 0x50d   :  { %966 = vmatmul.mubr.msk.bf16.vlgmr.msra.gmra.mrb[12].mxu0 %vm140_vm0, %v637_v44  ;;  %971 = vmatprep.subr.bf16.mxu1 %v1154_v58 }
 0x510   :  { %972 = vmatpush3.bf16.msra.mxu1 %v1013_v54 }
 0x511   :  { %973 = vmatprep.subr.bf16.mxu1 %v1154_v58 }
 0x514   :  { %974 = vmatpush3.bf16.msra.mxu1 %v1014_v45 }
 0x515   :  { %975 = vmatprep.subr.bf16.mxu1 %v1154_v58 }
 0x518   :  { %976 = vmatpush3.bf16.msra.mxu1 %v1015_v55 }
 0x5de   :  { %v675_v60 = vpop.f32.mrb[12].mxu1 }
 0x5df   :  { %v955_v61 = vpop.f32.mrb[13].mxu1 }
 0x5e0   :  { %v678_v62 = vpop.f32.mrb[14].mxu1  ;;  %v718_v63 = vpop.f32.mrb[12].mxu0 }
 0x5e1   :  { %v724_v6 = vpack.c.bf16 %v718_v63, %v675_v60  ;;  %v956_v10 = vpop.f32.mrb[15].mxu1  ;;  %v967_v11 = vpop.f32.mrb[13].mxu0 }
 0x5e2   :  { %v721_v12 = vpop.f32.mrb[14].mxu0 }
 0x5e3   :  { %v968_v13 = vpop.f32.mrb[15].mxu0  ;;  %978 = vmatmul.mubr.msk.bf16.vlgmr.msra.gmra.mrb[16].mxu1 %vm140_vm0, %v724_v6 }
 0x6b6   :  { %v794_v14 = vpop.f32.mrb[16].mxu1 }
 0x6b7   :  { %801 = vst.msk [vmem:[#allocation10] sm:$0xff] %vm140_vm0, %v794_v14  ;;  %v979_v15 = vpop.f32.mrb[17].mxu1 }
 0x6b8   :  { %v797_v58 = vpop.f32.mrb[18].mxu1 }
 0x6b9   :  { %802 = vst.msk [vmem:[#allocation10 + $0x8] sm:$0xff] %vm140_vm0, %v797_v58  ;;  %v980_v16 = vpop.f32.mrb[19].mxu1 }
 0x6ba   :  { %1123 = shalt.err (!%p1120_p8)
}
 0x6bb   :  { %s1124_s28 = scalar_lea.hbm %s1592_s8, 256 }
 0x6bc   :  { %p1125_p9 = scmp.ne.s32.totalorder %s1592_s8, %s1124_s28  ;;  %p1128_p10 = scmp.lt.u32.totalorder %s1124_s28, %s1592_s8 }
 0x6be   :  { %p1130_p11 = pnand %p1128_p10, %p1125_p9 }
 0x6c0   :  { %1133 = shalt.err (!%p1130_p11)
}
 0x6c1   :  { %814 = dma.vmem_to_hbm [thread:$0]  %s809_s24, 256, %s1592_s8, [#allocation4], %s1150_s4, %s1150_s4, %s1151_s14  }
 0x6c2   :  { %1140 = dma.done.wait [#allocation4], 256  }
 0x6c3   :  { %1141 = vsyncadd [#allocation4], 4294967040 }
 0x6c4   :  { %826 = vsyncpa [#allocation3], 1 }
 0x6c5   :  { %827 = vsyncpa [#allocation6], 1 }
 0x6c6   :  { %828 = vsyncpa [#allocation9], 1 }
 0x6c7   :  { %829 = vsyncpa [#allocation4], 1 }

</bundles_post_ra>
